<compile_context>
chip_gen: v7x
topology: tpu7x:2x2x1
jax: 0.10.0
libtpu: 0.0.40
codegen_flags: <defaults>
</compile_context>

<pallas_src>
import functools
import math

import jax
import jax.numpy as jnp
import numpy as np
from jax.experimental import pallas as pl
from jax.experimental.pallas import tpu as pltpu

_VMEM_LIMIT = 32 * 1024 * 1024    # explicit scoped-VMEM limit (safe v5e/v6e/v7x)
_VMEM_BUDGET = 24 * 1024 * 1024   # keep double-buffered footprints under this


def _fit(dim, pref, quantum):
    """Largest tile <= pref that divides `dim` and is a multiple of `quantum`.

    Falls back to the full dim (always a legal Pallas block), so blocks
    satisfy the TPU (8,128)/(16,128) tiling rules at any input size,
    including the toy shapes used in the test below.
    """
    t = (pref // quantum) * quantum
    while t >= quantum:
        if dim % t == 0:
            return t
        t -= quantum
    return dim


# ---------------------------------------------------------------------------
# Tiled linear: y = x @ w + b   (bf16 MXU operands, f32 accumulation)
# ---------------------------------------------------------------------------
def _linear_kernel_1k(x_ref, w_ref, b_ref, o_ref):
    # Whole K in one tile: single MXU pass per output tile, bias fused into
    # the only store.  No accumulator scratch, no revisit pattern.
    o_ref[...] = (jnp.dot(x_ref[...], w_ref[...],
                          preferred_element_type=jnp.float32)
                  + b_ref[...]).astype(o_ref.dtype)


def _linear_kernel_acc(x_ref, w_ref, b_ref, o_ref, acc_ref):
    kk = pl.program_id(2)

    @pl.when(kk == 0)
    def _init():
        acc_ref[...] = jnp.zeros_like(acc_ref)

    acc_ref[...] += jnp.dot(x_ref[...], w_ref[...],
                            preferred_element_type=jnp.float32)

    @pl.when(kk == pl.num_programs(2) - 1)
    def _finalize():
        o_ref[...] = (acc_ref[...] + b_ref[...]).astype(o_ref.dtype)


def linear(x2d, w, b, *, out_dtype=jnp.float32,
           tm_pref=512, tn_pref=768, tk_pref=512):
    """x2d: (M, K) @ w: (K, N) + b: (N,) -> (M, N), tiled & pipelined."""
    M, K = x2d.shape
    N = w.shape[1]
    tm = _fit(M, tm_pref, 16)      # 16: bf16 sublane quantum (full-dim fallback)
    tn = _fit(N, tn_pref, 128)

    xb = x2d.astype(jnp.bfloat16)
    wb = w.astype(jnp.bfloat16)
    b2 = b.reshape(1, N).astype(jnp.float32)
    ob = jnp.dtype(out_dtype).itemsize

    # Double-buffered VMEM footprint of the single-K-tile path.
    fp_1k = 2 * (tm * K * 2 + K * tn * 2 + tn * 4 + tm * tn * ob)

    if fp_1k <= _VMEM_BUDGET:
        # GPT-2-sized K fits one tile: drop the K grid axis entirely.
        return pl.pallas_call(
            _linear_kernel_1k,
            out_shape=jax.ShapeDtypeStruct((M, N), out_dtype),
            grid=(N // tn, M // tm),            # w tile resident, x streams
            in_specs=[
                pl.BlockSpec((tm, K), lambda j, i: (i, 0)),
                pl.BlockSpec((K, tn), lambda j, i: (0, j)),
                pl.BlockSpec((1, tn), lambda j, i: (0, j)),
            ],
            out_specs=pl.BlockSpec((tm, tn), lambda j, i: (i, j)),
            compiler_params=pltpu.CompilerParams(
                dimension_semantics=("parallel", "parallel"),
                vmem_limit_bytes=_VMEM_LIMIT),
        )(xb, wb, b2)

    # Large-K fallback: tiled reduction with an f32 VMEM accumulator.
    tk = _fit(K, tk_pref, 128)
    return pl.pallas_call(
        _linear_kernel_acc,
        out_shape=jax.ShapeDtypeStruct((M, N), out_dtype),
        grid=(N // tn, M // tm, K // tk),
        in_specs=[
            pl.BlockSpec((tm, tk), lambda j, i, kk: (i, kk)),
            pl.BlockSpec((tk, tn), lambda j, i, kk: (kk, j)),
            pl.BlockSpec((1, tn), lambda j, i, kk: (0, j)),
        ],
        out_specs=pl.BlockSpec((tm, tn), lambda j, i, kk: (i, j)),
        scratch_shapes=[pltpu.VMEM((tm, tn), jnp.float32)],
        compiler_params=pltpu.CompilerParams(
            dimension_semantics=("parallel", "parallel", "arbitrary"),
            vmem_limit_bytes=_VMEM_LIMIT),
    )(xb, wb, b2)


# ---------------------------------------------------------------------------
# Flash-style causal attention over the packed qkv slab.
# Triangular grid: one program per (batch, lower-triangle block) pair.
# ---------------------------------------------------------------------------
def _flash_attn_kernel(qi_tbl, ki_tbl, q_ref, k_ref, v_ref, o_ref,
                       m_sc, l_sc, acc_sc, *, n_head, hd, gw, n_groups, hpg):
    s_idx = pl.program_id(1)
    qi = qi_tbl[s_idx]                  # query block index (from SMEM table)
    ki = ki_tbl[s_idx]                  # key/value block index
    blk = q_ref.shape[1]

    # Process q rows in <=128-row sub-chunks so the per-head score tile stays
    # at most (128, blk) f32 (bounded vreg pressure at blk=256).
    if blk > 128:
        chunks = [(c0, min(128, blk - c0)) for c0 in range(0, blk, 128)]
    else:
        chunks = [(0, blk)]

    @pl.when(ki == 0)
    def _init():
        m_sc[...] = jnp.full_like(m_sc, -1e30)
        l_sc[...] = jnp.zeros_like(l_sc)
        acc_sc[...] = jnp.zeros_like(acc_sc)

    def attn_step(masked):
        for g in range(n_groups):
            goff = g * gw
            # Lane-dense (128-aligned for real model widths) group loads that
            # cover all heads of the group; sliced per head as values.
            kg = k_ref[0, :, goff:goff + gw]          # (blk, gw) bf16
            vg = v_ref[0, :, goff:goff + gw]
            for (c0, csz) in chunks:
                qg = q_ref[0, c0:c0 + csz, goff:goff + gw]   # (csz, gw) bf16
                if masked:
                    # Diagonal block only (ki == qi): the mask is static.
                    r = jax.lax.broadcasted_iota(jnp.int32, (csz, blk), 0)
                    c = jax.lax.broadcasted_iota(jnp.int32, (csz, blk), 1)
                    causal = c <= (r + c0)
                pv_parts = []
                alpha_parts = []
                for j in range(hpg):
                    h = g * hpg + j
                    hoff = j * hd
                    qh = qg[:, hoff:hoff + hd]
                    kh = kg[:, hoff:hoff + hd]
                    vh = vg[:, hoff:hoff + hd]
                    # q.k^T contracting the last axes (no K transpose
                    # materialized); f32 accumulation on the MXU.  The
                    # 1/sqrt(hd) scale is already baked into q.
                    s = jax.lax.dot_general(
                        qh, kh, (((1,), (1,)), ((), ())),
                        preferred_element_type=jnp.float32)   # (csz, blk)
                    if masked:
                        s = jnp.where(causal, s, -1e30)       # finite, NaN-safe
                    m_prev = m_sc[h, c0:c0 + csz]              # (csz, 1)
                    m_new = jnp.maximum(m_prev,
                                        jnp.max(s, axis=-1, keepdims=True))
                    alpha = jnp.exp(m_prev - m_new)
                    p = jnp.exp(s - m_new)
                    l_sc[h, c0:c0 + csz] = (alpha * l_sc[h, c0:c0 + csz]
                                            + jnp.sum(p, axis=-1, keepdims=True))
                    m_sc[h, c0:c0 + csz] = m_new
                    pv_parts.append(jnp.dot(p.astype(vh.dtype), vh,
                                            preferred_element_type=jnp.float32))
                    alpha_parts.append(jnp.broadcast_to(alpha, (csz, hd)))
                # One full-width (gw-lane) accumulator update per group.
                pv_g = (jnp.concatenate(pv_parts, axis=-1)
                        if hpg > 1 else pv_parts[0])
                alpha_g = (jnp.concatenate(alpha_parts, axis=-1)
                           if hpg > 1 else alpha_parts[0])
                acc_sc[g, c0:c0 + csz] = (alpha_g * acc_sc[g, c0:c0 + csz]
                                          + pv_g)

    # Off-diagonal kv blocks are fully visible: no mask work at all.
    @pl.when(ki < qi)
    def _off_diag():
        attn_step(masked=False)

    # The diagonal block is the last contributing kv step for this q block:
    # apply the causal mask, then normalize and write lane-dense group slabs.
    @pl.when(ki == qi)
    def _diag():
        attn_step(masked=True)
        for g in range(n_groups):
            goff = g * gw
            inv_parts = []
            for j in range(hpg):
                h = g * hpg + j
                inv = pl.reciprocal(l_sc[h], approx=True)      # EUP, ~free
                inv_parts.append(jnp.broadcast_to(inv, (blk, hd)))
            inv_g = (jnp.concatenate(inv_parts, axis=-1)
                     if hpg > 1 else inv_parts[0])
            o_ref[0, :, goff:goff + gw] = (acc_sc[g] * inv_g).astype(o_ref.dtype)


def flash_causal_attention(qkv, n_head, *, blk_pref=256):
    """qkv: (B, T, 3C) packed projections -> (B, T, C) attention output."""
    B, T, C3 = qkv.shape
    C = C3 // 3
    hd = C // n_head
    blk = _fit(T, blk_pref, 16)          # bf16 sublane quantum; full-dim fallback
    nt = T // blk

    # Flattened lower-triangle step table: for each q block, kv blocks 0..qi.
    # No wasted upper-triangle grid steps and no skipped-block DMAs.
    qi_list, ki_list = [], []
    for qi in range(nt):
        for ki in range(qi + 1):
            qi_list.append(qi)
            ki_list.append(ki)
    qi_tbl = jnp.asarray(qi_list, dtype=jnp.int32)
    ki_tbl = jnp.asarray(ki_list, dtype=jnp.int32)
    n_steps = len(qi_list)

    if C % 128 == 0:
        # Lane-dense path for real model widths: read q/k/v directly out of
        # the packed (B, T, 3C) slab via column-block offsets 0/1/2.
        q_in = k_in = v_in = qkv
        k_col, v_col = 1, 2
    else:
        # Small-C fallback (toy test): contiguous last-dim slices so every
        # block's last dim equals the array's full last dim.
        q_in = jax.lax.slice_in_dim(qkv, 0, C, axis=2)
        k_in = jax.lax.slice_in_dim(qkv, C, 2 * C, axis=2)
        v_in = jax.lax.slice_in_dim(qkv, 2 * C, 3 * C, axis=2)
        k_col, v_col = 0, 0

    # Head grouping: 128-lane groups (head pairing for hd=64) when possible.
    if C % 128 == 0 and hd <= 128 and 128 % hd == 0:
        gw = 128
    elif C <= 128:
        gw = C
    else:
        gw = hd
    n_groups = C // gw
    hpg = gw // hd

    def q_map(b, s, qi_t, ki_t):
        return (b, qi_t[s], 0)

    def k_map(b, s, qi_t, ki_t):
        return (b, ki_t[s], k_col)

    def v_map(b, s, qi_t, ki_t):
        return (b, ki_t[s], v_col)

    grid_spec = pltpu.PrefetchScalarGridSpec(
        num_scalar_prefetch=2,
        grid=(B, n_steps),
        in_specs=[
            pl.BlockSpec((1, blk, C), q_map),
            pl.BlockSpec((1, blk, C), k_map),
            pl.BlockSpec((1, blk, C), v_map),
        ],
        out_specs=pl.BlockSpec((1, blk, C), q_map),
        scratch_shapes=[
            pltpu.VMEM((n_head, blk, 1), jnp.float32),       # running max m
            pltpu.VMEM((n_head, blk, 1), jnp.float32),       # running sum l
            pltpu.VMEM((n_groups, blk, gw), jnp.float32),    # lane-dense acc
        ])

    return pl.pallas_call(
        functools.partial(_flash_attn_kernel, n_head=n_head, hd=hd, gw=gw,
                          n_groups=n_groups, hpg=hpg),
        out_shape=jax.ShapeDtypeStruct((B, T, C), jnp.bfloat16),
        grid_spec=grid_spec,
        compiler_params=pltpu.CompilerParams(
            # Batch axis independent -> megacore sharding; the flattened
            # triangular step axis is the sequential online-softmax sweep.
            dimension_semantics=("parallel", "arbitrary"),
            vmem_limit_bytes=_VMEM_LIMIT),
    )(qi_tbl, ki_tbl, q_in, k_in, v_in)


# ---------------------------------------------------------------------------
# Full module forward.
# ---------------------------------------------------------------------------
def causal_self_attention(x, w_attn, b_attn, w_proj, b_proj, n_head):
    """Matches CausalSelfAttention.forward: x (B,T,C) f32 -> (B,T,C) f32."""
    B, T, C = x.shape
    hd = C // n_head
    scale = 1.0 / math.sqrt(hd)

    # Bake the attention scale into the q projection columns (would normally
    # be folded once at parameter-load time).
    col_scale = jnp.concatenate([
        jnp.full((C,), scale, dtype=w_attn.dtype),
        jnp.ones((2 * C,), dtype=w_attn.dtype)])
    w_attn_s = w_attn * col_scale[None, :]
    b_attn_s = b_attn * col_scale

    # qkv projection, kept packed (B,T,3C) in bf16 (halves HBM traffic; all
    # matmuls accumulate in f32).
    qkv = linear(x.reshape(B * T, C), w_attn_s, b_attn_s,
                 out_dtype=jnp.bfloat16).reshape(B, T, 3 * C)
    # flash-style causal attention; heads handled inside the kernel, output
    # written directly into a (B,T,C) slab (no head transposes outside).
    y = flash_causal_attention(qkv, n_head)            # (B, T, C) bf16
    # output projection back to f32.
    y = linear(y.reshape(B * T, C), w_proj, b_proj, out_dtype=jnp.float32)
    return y.reshape(B, T, C)


# ---------------------------------------------------------------------------
# Pure-jnp f32 reference for the correctness check.
# ---------------------------------------------------------------------------
def _reference(x, w_attn, b_attn, w_proj, b_proj, n_head):
    B, T, C = x.shape
    hd = C // n_head
    qkv = x @ w_attn + b_attn
    q, k, v = jnp.split(qkv, 3, axis=2)
    q = q.reshape(B, T, n_head, hd).transpose(0, 2, 1, 3)
    k = k.reshape(B, T, n_head, hd).transpose(0, 2, 1, 3)
    v = v.reshape(B, T, n_head, hd).transpose(0, 2, 1, 3)
    att = (q @ jnp.swapaxes(k, -2, -1)) * (1.0 / math.sqrt(hd))
    mask = jnp.tril(jnp.ones((T, T), dtype=bool))
    att = jnp.where(mask[None, None], att, -jnp.inf)
    att = jax.nn.softmax(att, axis=-1)
    y = att @ v
    y = y.transpose(0, 2, 1, 3).reshape(B, T, C)
    return y @ w_proj + b_proj


if __name__ == "__main__":
    B, T, C, n_head = 2, 8, 32, 4       # block_size >= T; head_dim = 8

    key = jax.random.PRNGKey(0)
    kx, k1, k2, k3, k4 = jax.random.split(key, 5)
    x = jax.random.normal(kx, (B, T, C), dtype=jnp.float32)
    # c_attn: Linear(C -> 3C); c_proj: Linear(C -> C)  (stored as (in, out))
    w_attn = 0.02 * jax.random.normal(k1, (C, 3 * C), dtype=jnp.float32)
    b_attn = 0.02 * jax.random.normal(k2, (3 * C,), dtype=jnp.float32)
    w_proj = 0.02 * jax.random.normal(k3, (C, C), dtype=jnp.float32)
    b_proj = 0.02 * jax.random.normal(k4, (C,), dtype=jnp.float32)

    y = causal_self_attention(x, w_attn, b_attn, w_proj, b_proj, n_head)
    y = jax.block_until_ready(y)

    y_ref = _reference(x, w_attn, b_attn, w_proj, b_proj, n_head)
    # bf16 MXU operands (f32 accumulation) -> compare at bf16-level tolerance.
    np.testing.assert_allclose(np.asarray(y, dtype=np.float32),
                               np.asarray(y_ref, dtype=np.float32),
                               rtol=5e-2, atol=5e-3)

    print("KERNEL_OK")
</pallas_src>

<mosaic_0001>
module attributes {stable_mosaic.version = 11 : i64} {
  func.func @_linear_kernel_1k(%arg0: i32, %arg1: i32, %arg2: memref<16x32xbf16, #tpu.memory_space<vmem>>, %arg3: memref<32x96xbf16, #tpu.memory_space<vmem>>, %arg4: memref<1x96xf32, #tpu.memory_space<vmem>>, %arg5: memref<16x96xbf16, #tpu.memory_space<vmem>>) attributes {dimension_semantics = [#tpu.dimension_semantics<parallel>, #tpu.dimension_semantics<parallel>], iteration_bounds = array<i64: 1, 1>, scalar_prefetch = 0 : i64, scratch_operands = 0 : i64, tpu.core_type = #tpu.core_type<tc>, window_params = [{transform_indices = @transform_0, window_bounds = array<i64: 16, 32>}, {transform_indices = @transform_1, window_bounds = array<i64: 32, 96>}, {transform_indices = @transform_2, window_bounds = array<i64: 1, 96>}, {transform_indices = @transform_3, window_bounds = array<i64: 16, 96>}]} {
    %c0 = arith.constant 0 : index
    %c0_0 = arith.constant 0 : index
    %0 = vector.load %arg2[%c0, %c0_0] : memref<16x32xbf16, #tpu.memory_space<vmem>>, vector<16x32xbf16>
    %c0_1 = arith.constant 0 : index
    %c0_2 = arith.constant 0 : index
    %1 = vector.load %arg3[%c0_1, %c0_2] : memref<32x96xbf16, #tpu.memory_space<vmem>>, vector<32x96xbf16>
    %cst = arith.constant dense<0.000000e+00> : vector<16x96xf32>
    %2 = tpu.matmul %0, %1, %cst {dimension_numbers = #tpu.dot_dimension_numbers<[1], [0], [0], [1], [0, 0, 1, 1], [], []>} : vector<16x32xbf16>, vector<32x96xbf16>, vector<16x96xf32> -> vector<16x96xf32>
    %c0_3 = arith.constant 0 : index
    %c0_4 = arith.constant 0 : index
    %3 = vector.load %arg4[%c0_3, %c0_4] : memref<1x96xf32, #tpu.memory_space<vmem>>, vector<1x96xf32>
    %4 = vector.broadcast %3 : vector<1x96xf32> to vector<16x96xf32>
    %5 = arith.addf %2, %4 : vector<16x96xf32>
    %6 = arith.truncf %5 : vector<16x96xf32> to vector<16x96xbf16>
    %c0_5 = arith.constant 0 : index
    %c0_6 = arith.constant 0 : index
    %7 = vector.load %arg5[%c0_5, %c0_6] : memref<16x96xbf16, #tpu.memory_space<vmem>>, vector<16x96xbf16>
    tpu.vector_store %arg5[%c0_5, %c0_6], %6 {strides = array<i32>} : memref<16x96xbf16, #tpu.memory_space<vmem>>, vector<16x96xbf16>,
    return
  }
  func.func @transform_0(%arg0: i32, %arg1: i32) -> (i32, i32) {
    %c0_i32 = arith.constant 0 : i32
    %c0_i32_0 = arith.constant 0 : i32
    return %arg1, %c0_i32 : i32, i32
  }
  func.func @transform_1(%arg0: i32, %arg1: i32) -> (i32, i32) {
    %c0_i32 = arith.constant 0 : i32
    %c0_i32_0 = arith.constant 0 : i32
    return %c0_i32, %arg0 : i32, i32
  }
  func.func @transform_2(%arg0: i32, %arg1: i32) -> (i32, i32) {
    %c0_i32 = arith.constant 0 : i32
    %c0_i32_0 = arith.constant 0 : i32
    return %c0_i32, %arg0 : i32, i32
  }
  func.func @transform_3(%arg0: i32, %arg1: i32) -> (i32, i32) {
    %c0_i32 = arith.constant 0 : i32
    return %arg1, %arg0 : i32, i32
  }
}

</mosaic_0001>

<bundles_post_ra>
// kernel: tpu_custom_call.1
= control target key start
LH: loop header
LB: loop body
LE: loop exit
PB: predicated region body
PF: predicated region fallthrough
CT: control target
= control target key end

     0   :  { %8 = vsyncpa [#allocation3], 0  ;;  %s325_s0 = inlined_call_operand.hbm [shape: bf16[16,32], index: 0, kind: input, shape index: {}]   ;;  %s326_s1 = inlined_call_operand.hbm [shape: bf16[32,96], index: 1, kind: input, shape index: {}]   ;;  %s327_s2 = inlined_call_operand.vmem [shape: f32[1,96], index: 2, kind: input, shape index: {}]   ;;  %s328_s3 = inlined_call_operand.hbm [shape: bf16[16,96], index: 3, kind: output, shape index: {}]  }
   0x1   :  { %9 = vsyncpa [#allocation6], 0 }
   0x2   :  { %10 = vsyncpa [#allocation4], 0  ;;  %s250_s12 = smov [#allocation2]   ;;  %s178_s16 = scalar_lea.hbm %s325_s0, 128 }
   0x3   :  { %s16_s13 = sshll.u32 %s250_s12, 4  ;;  %p179_p0 = scmp.ne.s32.totalorder %s325_s0, %s178_s16  ;;  %s17_s13 = int_to_ptr.vmem [resolvable:$true] %s16_s13 }
   0x4   :  { %p182_p1 = scmp.lt.u32.totalorder %s178_s16, %s325_s0 }
   0x6   :  { %p184_p2 = pnand %p182_p1, %p179_p0 }
   0x8   :  { %187 = shalt.err (!%p184_p2)
}
   0x9   :  { %s188_s21 = scalar_lea.vmem %s17_s13, 128  ;;  %p193_p4 = scmp.lt.s32.totalorder %s17_s13, %s17_s13 }
   0xa   :  { %p189_p3 = scmp.ne.s32.totalorder %s17_s13, %s188_s21  ;;  %p194_p5 = scmp.lt.s32.totalorder %s188_s21, %s188_s21 }
   0xc   :  { %p195_p6 = por %p194_p5, %p193_p4 }
   0xe   :  { %p196_p7 = pnand %p195_p6, %p189_p3 }
  0x10   :  { %199 = shalt.err (!%p196_p7)
}
  0x11   :  { %s251_s22 = smov 64   ;;  %s252_s23 = smov 4  }
  0x12   :  { %22 = dma.hbm_to_vmem [thread:$0]  %s325_s0, 128, %s17_s13, [#allocation3], %s251_s22, %s251_s22, %s252_s23  }
  0x13   :  { %s253_s26 = smov [#allocation5]   ;;  %s200_s30 = scalar_lea.hbm %s326_s1, 256 }
  0x14   :  { %s28_s27 = sshll.u32 %s253_s26, 4  ;;  %p201_p8 = scmp.ne.s32.totalorder %s326_s1, %s200_s30  ;;  %s29_s27 = int_to_ptr.vmem [resolvable:$true] %s28_s27 }
  0x15   :  { %p204_p9 = scmp.lt.u32.totalorder %s200_s30, %s326_s1 }
  0x17   :  { %p206_p10 = pnand %p204_p9, %p201_p8 }
  0x19   :  { %209 = shalt.err (!%p206_p10)
}
  0x1a   :  { %s210_s8 = scalar_lea.vmem %s29_s27, 256  ;;  %p215_p12 = scmp.lt.s32.totalorder %s29_s27, %s29_s27 }
  0x1b   :  { %p211_p11 = scmp.ne.s32.totalorder %s29_s27, %s210_s8  ;;  %p216_p13 = scmp.lt.s32.totalorder %s210_s8, %s210_s8 }
  0x1d   :  { %p217_p0 = por %p216_p13, %p215_p12 }
  0x1f   :  { %p218_p1 = pnand %p217_p0, %p211_p11 }
  0x21   :  { %221 = shalt.err (!%p218_p1)
}
  0x22   :  { %34 = dma.hbm_to_vmem [thread:$0]  %s326_s1, 256, %s29_s27, [#allocation6], %s251_s22, %s251_s22, %s252_s23  }
  0x23   :  { %244 = dma.done.wait [#allocation3], 128  }
  0x24   :  { %245 = vsyncadd [#allocation3], 4294967168 }
  0x25   :  { %246 = dma.done.wait [#allocation6], 256  }
  0x26   :  { %247 = vsyncadd [#allocation6], 4294967040  ;;  %v254_v0 = vmov 0.0   ;;  %vm255_vm0 = vmmov 0   ;;  %v175_v1 = vld [vmem:[#allocation5] sm:$0xff]   ;;  %v176_v2 = vld [vmem:[#allocation5 + $0x8] sm:$0xff]  }
  0x27   :  { %160 = vmatprep.subr.bf16.mxu0 %v254_v0  ;;  %164 = vmatprep.mubr.msk.bf16.mxu0 %vm255_vm0, %v254_v0  ;;  %v177_v3 = vld [vmem:[#allocation2] sm:$0xff]   ;;  %vm74_vm1 = vcmask 261120   ;;  %vm127_vm2 = vcmask 781312   ;;  %s256_s1 = smov [#allocation7]  }
  0x28   :  { %161 = vmatpush3.bf16.msra.mxu0 %v175_v1  ;;  %v148_v4 = vld [vmem:[%s327_s2] ss:$0 sm:$0xff]  ;;  %s135_s12 = sshll.u32 %s256_s1, 4  ;;  %s136_s12 = int_to_ptr.vmem [resolvable:$true] %s135_s12 }
  0x29   :  { %162 = vmatprep.subr.bf16.mxu0 %v254_v0  ;;  %s222_s13 = scalar_lea.vmem %s136_s12, 128  ;;  %p227_p3 = scmp.lt.s32.totalorder %s136_s12, %s136_s12 }
  0x2a   :  { %p223_p2 = scmp.ne.s32.totalorder %s136_s12, %s222_s13  ;;  %p228_p4 = scmp.lt.s32.totalorder %s222_s13, %s222_s13 }
  0x2c   :  { %163 = vmatpush3.bf16.msra.mxu0 %v176_v2  ;;  %p229_p5 = por %p228_p4, %p227_p3 }
  0x2e   :  { %p230_p6 = pnand %p229_p5, %p223_p2 }
  0x2f   :  { %165 = vmatmul.mubr.msk.bf16.vlgmr.msra.gmra.mrb[0].mxu0 %vm74_vm1, %v177_v3 }
 0x102   :  { %v112_v5 = vpop.f32.mrb[0].mxu0 }
 0x103   :  { %v113_v6 = vadd.f32 %v148_v4, %v112_v5  ;;  %v166_v7 = vpop.f32.mrb[1].mxu0 }
 0x104   :  { %v115_v8 = vpop.f32.mrb[2].mxu0 }
 0x105   :  { %v155_v9 = vpack.c.bf16 %v113_v6, %v113_v6  ;;  %v116_v10 = vadd.f32 %v148_v4, %v115_v8  ;;  %v167_v11 = vpop.f32.mrb[3].mxu0 }
 0x107   :  { %v156_v12 = vpack.c.bf16 %v116_v10, %v116_v10  ;;  %128 = vst.msk [vmem:[#allocation7] sm:$0xf] %vm127_vm2, %v155_v9 }
 0x109   :  { %129 = vst.msk [vmem:[#allocation7 + $0x4] sm:$0xf] %vm127_vm2, %v156_v12 }
 0x10a   :  { %233 = shalt.err (!%p230_p6)
}
 0x10b   :  { %s234_s15 = scalar_lea.hbm %s328_s3, 128 }
 0x10c   :  { %p235_p7 = scmp.ne.s32.totalorder %s328_s3, %s234_s15  ;;  %p238_p8 = scmp.lt.u32.totalorder %s234_s15, %s328_s3 }
 0x10e   :  { %p240_p9 = pnand %p238_p8, %p235_p7 }
 0x110   :  { %243 = shalt.err (!%p240_p9)
}
 0x111   :  { %141 = dma.vmem_to_hbm [thread:$0]  %s136_s12, 128, %s328_s3, [#allocation4], %s251_s22, %s251_s22, %s252_s23  }
 0x112   :  { %248 = dma.done.wait [#allocation4], 128  }
 0x113   :  { %249 = vsyncadd [#allocation4], 4294967168 }
 0x114   :  { %145 = vsyncpa [#allocation3], 1 }
 0x115   :  { %146 = vsyncpa [#allocation6], 1 }
 0x116   :  { %147 = vsyncpa [#allocation4], 1 }

</bundles_post_ra>
